<compile_context>
chip_gen: v5e
topology: v5e:2x2
jax: 0.10.0
libtpu: 0.0.40
codegen_flags: <defaults>
</compile_context>

<pallas_src>
import functools

import jax
import jax.numpy as jnp
from jax.experimental import pallas as pl
from jax.experimental.pallas import tpu as pltpu

LN_EPS = 1e-5          # CLIP config.layer_norm_eps default
_Q_TILE = 128          # query tile for the attention core


def _round_up(x, m):
    return ((x + m - 1) // m) * m


@functools.lru_cache(maxsize=None)
def _chip_config():
    """Per-generation VMEM limit / tile sizes.  Conservative fallback = v7x."""
    vmem_bytes = 64 * 1024 * 1024
    try:
        info = pltpu.get_tpu_info()
        for attr in ("vmem_capacity_bytes", "vmem_size_bytes", "vmem_bytes"):
            v = getattr(info, attr, None)
            if v:
                vmem_bytes = int(v)
                break
    except Exception:
        pass
    if vmem_bytes >= 100 * 1024 * 1024:          # v5e / v6e: 128 MiB physical
        return {"vmem_limit": 96 * 1024 * 1024,
                "row_tile_mxu": 512, "row_tile_mem": 1024}
    return {"vmem_limit": 48 * 1024 * 1024,      # v7x: 64 MiB physical
            "row_tile_mxu": 256, "row_tile_mem": 512}


def _row_tile(n, max_tile):
    return n if n <= max_tile else max_tile


def _const_spec(shape):
    """Constant operand (same block every grid step): single-buffered."""
    nd = len(shape)
    return pl.BlockSpec(shape, lambda *_: (0,) * nd,
                        pipeline_mode=pl.Buffered(1))


def _cparams(semantics):
    return pltpu.CompilerParams(dimension_semantics=semantics,
                                vmem_limit_bytes=_chip_config()["vmem_limit"])


def _layernorm(x, g, b):
    x = x.astype(jnp.float32)
    mu = jnp.mean(x, axis=-1, keepdims=True)
    var = jnp.mean((x - mu) ** 2, axis=-1, keepdims=True)
    return (x - mu) * jax.lax.rsqrt(var + LN_EPS) * g + b


# ----------------------------------------------------------------------------
# Patch embedding (stride==kernel conv rewritten as a row-tiled matmul)
# ----------------------------------------------------------------------------
def _matmul_rows_kernel(x_ref, w_ref, o_ref):
    o_ref[...] = jnp.dot(x_ref[...], w_ref[...],
                         preferred_element_type=jnp.float32)


def patch_embed_matmul(x_bf16, w_bf16):
    """x: [N, F] bf16, w: [F, D] bf16 -> [N, D] f32, tiled over rows."""
    N, F = x_bf16.shape
    D = w_bf16.shape[1]
    R = _row_tile(N, _chip_config()["row_tile_mem"])
    return pl.pallas_call(
        _matmul_rows_kernel,
        out_shape=jax.ShapeDtypeStruct((N, D), jnp.float32),
        grid=(pl.cdiv(N, R),),
        in_specs=[pl.BlockSpec((R, F), lambda i: (i, 0)),
                  _const_spec((F, D))],
        out_specs=pl.BlockSpec((R, D), lambda i: (i, 0)),
        compiler_params=_cparams(("parallel",)),
    )(x_bf16, w_bf16)


# ----------------------------------------------------------------------------
# Fused: (+ position embedding) + pre_layrnorm, output bf16 residual stream
# ----------------------------------------------------------------------------
def _pos_ln_kernel(emb_ref, pos_ref, g_ref, b_ref, o_ref):
    x = emb_ref[0] + pos_ref[...]
    o_ref[0] = _layernorm(x, g_ref[...], b_ref[...]).astype(o_ref.dtype)


def pos_ln_pallas(emb, pos, g, b):
    """emb: [B, S, D] f32, pos: [S, D] f32 -> [B, S, D] bf16 (pre-LN applied)."""
    B, S, D = emb.shape
    return pl.pallas_call(
        _pos_ln_kernel,
        out_shape=jax.ShapeDtypeStruct((B, S, D), jnp.bfloat16),
        grid=(B,),
        in_specs=[pl.BlockSpec((1, S, D), lambda i: (i, 0, 0)),
                  _const_spec((S, D)),
                  _const_spec((1, D)), _const_spec((1, D))],
        out_specs=pl.BlockSpec((1, S, D), lambda i: (i, 0, 0)),
        compiler_params=_cparams(("parallel",)),
    )(emb, pos, g, b)


# ----------------------------------------------------------------------------
# Row-tiled LayerNorm (post_layernorm for pooled output)
# ----------------------------------------------------------------------------
def _layernorm_kernel(x_ref, g_ref, b_ref, o_ref):
    o_ref[...] = _layernorm(x_ref[...], g_ref[...], b_ref[...])


def layernorm_rows(x, g, b):
    N, D = x.shape
    R = _row_tile(N, _chip_config()["row_tile_mem"])
    return pl.pallas_call(
        _layernorm_kernel,
        out_shape=jax.ShapeDtypeStruct((N, D), jnp.float32),
        grid=(pl.cdiv(N, R),),
        in_specs=[pl.BlockSpec((R, D), lambda i: (i, 0)),
                  _const_spec((1, D)), _const_spec((1, D))],
        out_specs=pl.BlockSpec((R, D), lambda i: (i, 0)),
        compiler_params=_cparams(("parallel",)),
    )(x, g, b)


# ----------------------------------------------------------------------------
# Kernel A: LN1 + fused QKV projection (row-tiled), q pre-scaled, bf16 outputs
# ----------------------------------------------------------------------------
def _ln_qkv_kernel(h_ref, g_ref, b_ref, wqkv_ref, bqkv_ref,
                   q_ref, k_ref, v_ref, *, dim, scale):
    h1 = _layernorm(h_ref[...], g_ref[...], b_ref[...])
    qkv = jnp.dot(h1.astype(jnp.bfloat16), wqkv_ref[...],
                  preferred_element_type=jnp.float32) + bqkv_ref[...]
    q_ref[...] = (qkv[:, :dim] * scale).astype(jnp.bfloat16)
    k_ref[...] = qkv[:, dim:2 * dim].astype(jnp.bfloat16)
    v_ref[...] = qkv[:, 2 * dim:].astype(jnp.bfloat16)


def ln_qkv_pallas(hidden2d, ln_g, ln_b, wqkv, bqkv, *, scale):
    N, D = hidden2d.shape
    R = _row_tile(N, _chip_config()["row_tile_mxu"])
    kernel = functools.partial(_ln_qkv_kernel, dim=D, scale=scale)
    out_sd = jax.ShapeDtypeStruct((N, D), jnp.bfloat16)
    row_d = pl.BlockSpec((R, D), lambda i: (i, 0))
    return pl.pallas_call(
        kernel,
        out_shape=(out_sd, out_sd, out_sd),
        grid=(pl.cdiv(N, R),),
        in_specs=[row_d, _const_spec((1, D)), _const_spec((1, D)),
                  _const_spec((D, 3 * D)), _const_spec((1, 3 * D))],
        out_specs=(row_d, row_d, row_d),
        compiler_params=_cparams(("parallel",)),
    )(hidden2d, ln_g, ln_b, wqkv, bqkv)


# ----------------------------------------------------------------------------
# Kernel B: attention core, grid=(B, query tiles).
# q/k/v are fed [B, S_pad, D] (lane-dense); head split/merge done in VMEM.
# ----------------------------------------------------------------------------
def _attn_core_kernel(q_ref, k_ref, v_ref, o_ref, *, num_heads, s_valid):
    TQ, D = q_ref.shape[1], q_ref.shape[2]
    S = k_ref.shape[1]
    hd = D // num_heads

    q2 = q_ref[0]                                            # [TQ, D] bf16
    k2 = k_ref[0]                                            # [S,  D] bf16
    v2 = v_ref[0]                                            # [S,  D] bf16

    q3 = q2.reshape(TQ, num_heads, hd).transpose(1, 0, 2)    # [H, TQ, hd]
    kT = k2.T.reshape(num_heads, hd, S)                      # [H, hd, S]
    v3 = v2.reshape(S, num_heads, hd).transpose(1, 0, 2)     # [H, S,  hd]

    s = jnp.einsum("hqd,hdk->hqk", q3, kT,
                   preferred_element_type=jnp.float32)       # [H, TQ, S]
    if s_valid < S:                                          # mask padded keys
        key_idx = jax.lax.broadcasted_iota(jnp.int32, (1, 1, S), 2)
        s = jnp.where(key_idx < s_valid, s, jnp.float32(-1e30))

    m = jnp.max(s, axis=-1, keepdims=True)
    e = jnp.exp(s - m)
    l = jnp.sum(e, axis=-1, keepdims=True)                   # [H, TQ, 1]
    ctx = jnp.einsum("hqk,hkd->hqd", e.astype(v3.dtype), v3,
                     preferred_element_type=jnp.float32)     # [H, TQ, hd]
    ctx = ctx * pl.reciprocal(l, approx=True)                # normalize post-PV

    out = ctx.transpose(1, 0, 2).reshape(TQ, D)              # merge heads
    o_ref[0] = out.astype(o_ref.dtype)


def attention_core_pallas(q, k, v, *, num_heads, s_valid):
    """q/k/v: [B, S_pad, D] bf16 -> ctx [B, S_pad, D] bf16."""
    B, S, D = q.shape
    TQ = S if S <= _Q_TILE else _Q_TILE
    kernel = functools.partial(_attn_core_kernel,
                               num_heads=num_heads, s_valid=s_valid)
    return pl.pallas_call(
        kernel,
        out_shape=jax.ShapeDtypeStruct((B, S, D), jnp.bfloat16),
        grid=(B, pl.cdiv(S, TQ)),
        in_specs=[pl.BlockSpec((1, TQ, D), lambda b, qi: (b, qi, 0)),
                  pl.BlockSpec((1, S, D), lambda b, qi: (b, 0, 0)),
                  pl.BlockSpec((1, S, D), lambda b, qi: (b, 0, 0))],
        out_specs=pl.BlockSpec((1, TQ, D), lambda b, qi: (b, qi, 0)),
        compiler_params=_cparams(("parallel", "parallel")),
    )(q, k, v)


# ----------------------------------------------------------------------------
# Kernel C: attention out-projection + residual + LN2 + MLP + residual (bf16 out)
# ----------------------------------------------------------------------------
def _proj_mlp_kernel(ctx_ref, res_ref, wo_ref, bo_ref,
                     g2_ref, b2_ref, w1_ref, fb1_ref, w2_ref, fb2_ref, o_ref):
    attn = jnp.dot(ctx_ref[...], wo_ref[...],
                   preferred_element_type=jnp.float32) + bo_ref[...]
    x2 = res_ref[...].astype(jnp.float32) + attn             # residual 1 (f32)
    h2 = _layernorm(x2, g2_ref[...], b2_ref[...])
    m1 = jnp.dot(h2.astype(jnp.bfloat16), w1_ref[...],
                 preferred_element_type=jnp.float32) + fb1_ref[...]
    m1 = m1 * jax.nn.sigmoid(1.702 * m1)                     # quick_gelu
    m2 = jnp.dot(m1.astype(jnp.bfloat16), w2_ref[...],
                 preferred_element_type=jnp.float32) + fb2_ref[...]
    o_ref[...] = (x2 + m2).astype(o_ref.dtype)               # residual 2, bf16


def proj_mlp_pallas(ctx2d, hidden2d, lp):
    # TODO(synk): for very large CLIP variants on v7x (64 MiB VMEM), tile the
    # MLP intermediate dim as an 'arbitrary' reduction grid axis with an f32
    # accumulator scratch instead of keeping full w1/w2 resident.
    N, D = hidden2d.shape
    inter = lp["w1"].shape[1]
    R = _row_tile(N, _chip_config()["row_tile_mxu"])
    row_d = pl.BlockSpec((R, D), lambda i: (i, 0))
    return pl.pallas_call(
        _proj_mlp_kernel,
        out_shape=jax.ShapeDtypeStruct((N, D), jnp.bfloat16),
        grid=(pl.cdiv(N, R),),
        in_specs=[row_d, row_d,
                  _const_spec((D, D)), _const_spec((1, D)),
                  _const_spec((1, D)), _const_spec((1, D)),
                  _const_spec((D, inter)), _const_spec((1, inter)),
                  _const_spec((inter, D)), _const_spec((1, D))],
        out_specs=row_d,
        compiler_params=_cparams(("parallel",)),
    )(ctx2d, hidden2d, lp["wo"], lp["bo"],
      lp["ln2_g"], lp["ln2_b"], lp["w1"], lp["b1"], lp["w2"], lp["b2"])


# ----------------------------------------------------------------------------
# Full forward (JAX glue around the Pallas kernels)
# ----------------------------------------------------------------------------
def clip_vision_forward(pixel_values, params, *, patch_size, num_heads,
                        output_hidden_states=False):
    B, C, H, W = pixel_values.shape
    p = patch_size
    gh, gw = H // p, W // p
    n_patches = gh * gw
    D = params["class_embedding"].shape[0]
    head_dim = D // num_heads
    scale = head_dim ** -0.5

    # Patch extraction == non-overlapping conv with stride p (feature order c, dh, dw)
    patches = pixel_values.reshape(B, C, gh, p, gw, p)
    patches = patches.transpose(0, 2, 4, 1, 3, 5).reshape(B * n_patches, C * p * p)
    w_patch = params["patch_weight"].reshape(D, C * p * p).T
    patch_embeds = patch_embed_matmul(patches.astype(jnp.bfloat16),
                                      w_patch.astype(jnp.bfloat16))
    patch_embeds = patch_embeds.reshape(B, n_patches, D)

    cls = jnp.broadcast_to(
        params["class_embedding"].astype(jnp.float32)[None, None, :], (B, 1, D))
    emb = jnp.concatenate([cls, patch_embeds], axis=1)       # [B, S_valid, D]
    s_valid = n_patches + 1

    # Pad S to a multiple of 8 (sublane-aligned blocks); pad keys are masked in
    # attention and pad rows are sliced off at the end.
    s_pad = _round_up(s_valid, 8)
    pos = params["position_embedding"].astype(jnp.float32)
    if s_pad != s_valid:
        emb = jnp.pad(emb, ((0, 0), (0, s_pad - s_valid), (0, 0)))
        pos = jnp.pad(pos, ((0, s_pad - s_valid), (0, 0)))

    # Fused: + position embedding -> pre_layrnorm -> bf16 residual stream
    hidden = pos_ln_pallas(emb, pos, params["pre_ln_g"], params["pre_ln_b"])
    N = B * s_pad
    hidden2d = hidden.reshape(N, D)                          # bf16 [N, D]

    all_hidden = ()
    if output_hidden_states:
        all_hidden = (hidden2d.reshape(B, s_pad, D)[:, :s_valid, :]
                      .astype(jnp.float32),)

    # TODO(synk): cross-layer weight prefetch (cross-call DMA futures / fused
    # layer-grid weight streaming) not implemented.
    for lp in params["layers"]:
        q, k, v = ln_qkv_pallas(hidden2d, lp["ln1_g"], lp["ln1_b"],
                                lp["wqkv"], lp["bqkv"], scale=scale)
        ctx = attention_core_pallas(q.reshape(B, s_pad, D),
                                    k.reshape(B, s_pad, D),
                                    v.reshape(B, s_pad, D),
                                    num_heads=num_heads, s_valid=s_valid)
        hidden2d = proj_mlp_pallas(ctx.reshape(N, D), hidden2d, lp)
        if output_hidden_states:
            all_hidden = all_hidden + (
                hidden2d.reshape(B, s_pad, D)[:, :s_valid, :].astype(jnp.float32),)

    last_hidden_state = (hidden2d.reshape(B, s_pad, D)[:, :s_valid, :]
                         .astype(jnp.float32))
    pooled = layernorm_rows(last_hidden_state[:, 0, :],
                            params["post_ln_g"], params["post_ln_b"])

    out = (last_hidden_state, pooled)
    if output_hidden_states:
        out = out + (all_hidden,)
    return out


class VisionEncoderPallas:
    """Mirrors _VisionEncoder(enc, interpolate_pos_encoding, output_hidden_states,
    output_attentions) with return_dict=False semantics."""

    def __init__(self, params, *, patch_size, num_heads,
                 interpolate_pos_encoding=False,
                 output_hidden_states=False,
                 output_attentions=False):
        # TODO(synk): interpolate_pos_encoding=True (bicubic pos-embed resize) not implemented.
        # TODO(synk): output_attentions=True (returning per-layer attn probs) not implemented.
        assert not interpolate_pos_encoding
        assert not output_attentions
        self.params = params
        self.patch_size = patch_size
        self.num_heads = num_heads
        self.output_hidden_states = output_hidden_states

    def __call__(self, inp):
        return clip_vision_forward(inp, self.params,
                                   patch_size=self.patch_size,
                                   num_heads=self.num_heads,
                                   output_hidden_states=self.output_hidden_states)


# ----------------------------------------------------------------------------
# Deterministic synthetic parameters (weights stored bf16, biases/LN f32)
# ----------------------------------------------------------------------------
def init_params(key, *, channels, patch, dim, seq, inter, layers):
    std = 0.02

    def nrm(k, shape, dtype=jnp.float32):
        return (std * jax.random.normal(k, shape)).astype(dtype)

    keys = jax.random.split(key, 8 + layers)
    params = {
        "class_embedding": nrm(keys[0], (dim,)),
        "patch_weight": nrm(keys[1], (dim, channels, patch, patch)),  # PyTorch conv layout
        "position_embedding": nrm(keys[2], (seq, dim)),
        "pre_ln_g": 1.0 + nrm(keys[3], (1, dim)),
        "pre_ln_b": nrm(keys[4], (1, dim)),
        "post_ln_g": 1.0 + nrm(keys[5], (1, dim)),
        "post_ln_b": nrm(keys[6], (1, dim)),
        "layers": [],
    }
    for li in range(layers):
        lk = jax.random.split(keys[8 + li], 12)
        params["layers"].append({
            "ln1_g": 1.0 + nrm(lk[0], (1, dim)), "ln1_b": nrm(lk[1], (1, dim)),
            "wqkv": nrm(lk[2], (dim, 3 * dim), jnp.bfloat16),   # fused [wq|wk|wv]
            "bqkv": nrm(lk[3], (1, 3 * dim)),
            "wo": nrm(lk[4], (dim, dim), jnp.bfloat16), "bo": nrm(lk[5], (1, dim)),
            "ln2_g": 1.0 + nrm(lk[6], (1, dim)), "ln2_b": nrm(lk[7], (1, dim)),
            "w1": nrm(lk[8], (dim, inter), jnp.bfloat16), "b1": nrm(lk[9], (1, inter)),
            "w2": nrm(lk[10], (inter, dim), jnp.bfloat16), "b2": nrm(lk[11], (1, dim)),
        })
    return params


if __name__ == "__main__":
    B, C, IMG, PATCH = 2, 3, 16, 8
    DIM, HEADS, INTER, LAYERS = 32, 2, 64, 2
    N_PATCHES = (IMG // PATCH) ** 2
    SEQ = N_PATCHES + 1

    key = jax.random.PRNGKey(0)
    k_x, k_p = jax.random.split(key)
    pixel_values = jax.random.normal(k_x, (B, C, IMG, IMG), dtype=jnp.float32)
    params = init_params(k_p, channels=C, patch=PATCH, dim=DIM,
                         seq=SEQ, inter=INTER, layers=LAYERS)

    enc = VisionEncoderPallas(params, patch_size=PATCH, num_heads=HEADS,
                              interpolate_pos_encoding=False,
                              output_hidden_states=False,
                              output_attentions=False)
    outs = enc(pixel_values)
    outs = jax.block_until_ready(outs)

    last_hidden_state, pooled_output = outs
    assert last_hidden_state.shape == (B, SEQ, DIM)
    assert pooled_output.shape == (B, DIM)
    assert bool(jnp.all(jnp.isfinite(last_hidden_state)))
    assert bool(jnp.all(jnp.isfinite(pooled_output)))
    print("KERNEL_OK")
</pallas_src>

<mosaic_0001>
module attributes {stable_mosaic.version = 11 : i64} {
  func.func @_matmul_rows_kernel(%arg0: i32, %arg1: memref<8x192xbf16, #tpu.memory_space<vmem>>, %arg2: memref<192x32xbf16, #tpu.memory_space<vmem>>, %arg3: memref<8x32xf32, #tpu.memory_space<vmem>>) attributes {dimension_semantics = [#tpu.dimension_semantics<parallel>], iteration_bounds = array<i64: 1>, scalar_prefetch = 0 : i64, scratch_operands = 0 : i64, tpu.core_type = #tpu.core_type<tc>, window_params = [{transform_indices = @transform_0, window_bounds = array<i64: 8, 192>}, {pipeline_mode = #tpu.pipeline_mode<synchronous>, transform_indices = @transform_1, window_bounds = array<i64: 192, 32>}, {transform_indices = @transform_2, window_bounds = array<i64: 8, 32>}]} {
    %c0 = arith.constant 0 : index
    %c0_0 = arith.constant 0 : index
    %0 = vector.load %arg1[%c0, %c0_0] : memref<8x192xbf16, #tpu.memory_space<vmem>>, vector<8x192xbf16>
    %c0_1 = arith.constant 0 : index
    %c0_2 = arith.constant 0 : index
    %1 = vector.load %arg2[%c0_1, %c0_2] : memref<192x32xbf16, #tpu.memory_space<vmem>>, vector<192x32xbf16>
    %cst = arith.constant dense<0.000000e+00> : vector<8x32xf32>
    %2 = tpu.matmul %0, %1, %cst {dimension_numbers = #tpu.dot_dimension_numbers<[1], [0], [0], [1], [0, 0, 1, 1], [], []>} : vector<8x192xbf16>, vector<192x32xbf16>, vector<8x32xf32> -> vector<8x32xf32>
    %c0_3 = arith.constant 0 : index
    %c0_4 = arith.constant 0 : index
    %3 = vector.load %arg3[%c0_3, %c0_4] : memref<8x32xf32, #tpu.memory_space<vmem>>, vector<8x32xf32>
    tpu.vector_store %arg3[%c0_3, %c0_4], %2 {strides = array<i32>} : memref<8x32xf32, #tpu.memory_space<vmem>>, vector<8x32xf32>,
    return
  }
  func.func @transform_0(%arg0: i32) -> (i32, i32) {
    %c0_i32 = arith.constant 0 : i32
    %c0_i32_0 = arith.constant 0 : i32
    return %arg0, %c0_i32 : i32, i32
  }
  func.func @transform_1(%arg0: i32) -> (i32, i32) {
    %c0_i32 = arith.constant 0 : i32
    %c0_i32_0 = arith.constant 0 : i32
    %c0_i32_1 = arith.constant 0 : i32
    return %c0_i32, %c0_i32_0 : i32, i32
  }
  func.func @transform_2(%arg0: i32) -> (i32, i32) {
    %c0_i32 = arith.constant 0 : i32
    %c0_i32_0 = arith.constant 0 : i32
    return %arg0, %c0_i32 : i32, i32
  }
}

</mosaic_0001>

<bundles_post_ra>
// kernel: tpu_custom_call.1
= control target key start
LH: loop header
LB: loop body
LE: loop exit
PB: predicated region body
PF: predicated region fallthrough
CT: control target
= control target key end

     0   :  { %s310_s0 = inlined_call_operand.vmem [shape: bf16[8,192], index: 0, kind: input, shape index: {}]   ;;  %s311_s1 = inlined_call_operand.vmem [shape: bf16[192,32], index: 1, kind: input, shape index: {}]   ;;  %s312_s2 = inlined_call_operand.hbm [shape: f32[8,32], index: 2, kind: output, shape index: {}]  }
   0x1   :  { %v220_v0 = vld [vmem:[%s311_s1 + $0x38] sm:$0xff]  ;;  %v219_v2 = vld [vmem:[%s311_s1 + $0x30] sm:$0xff] }
   0x2   :  { %v224_v1 = vld [vmem:[%s311_s1 + $0x58] sm:$0xff]  ;;  %120 = vmatpush.bf16.msra.mxu0 %v220_v0  ;;  %v223_v3 = vld [vmem:[%s311_s1 + $0x50] sm:$0xff] }
   0x3   :  { %137 = vmatpush.bf16.msra.mxu1 %v224_v1 }
   0x4   :  { %7 = vsyncpa [#allocation3], 0  ;;  %v218_v4 = vld [vmem:[%s311_s1 + $0x28] sm:$0xff]  ;;  %v13_v6 = vld [vmem:[%s310_s0] sm:$0xff]  ;;  %vm116_vm0 = vcmask 523264   ;;  %s252_s6 = smov [#allocation2]  }
   0x5   :  { %v222_v5 = vld [vmem:[%s311_s1 + $0x48] sm:$0xff]  ;;  %v217_v7 = vld [vmem:[%s311_s1 + $0x20] sm:$0xff]  ;;  %v40_v8 = vunpack.c.h.b16 %v13_v6  ;;  %v216_v10 = vld [vmem:[%s311_s1 + $0x18] sm:$0xff]  ;;  %v39_v14 = vunpack.c.l.b16 %v13_v6  ;;  %s153_s7 = sshll.u32 %s252_s6, 4  ;;  %s155_s10 = sshll.u32 %s312_s2, 4  ;;  %vm146_vm1 = vcmask 261120   ;;  %s154_s7 = int_to_ptr.vmem [resolvable:$true] %s153_s7  ;;  %s156_s10 = int_to_ptr.hbm [resolvable:$true] %s155_s10 }
   0x6   :  { %121 = vmatpush.bf16.msra.mxu0 %v219_v2  ;;  %v221_v9 = vld [vmem:[%s311_s1 + $0x40] sm:$0xff]  ;;  %v215_v12 = vld [vmem:[%s311_s1 + $0x10] sm:$0xff]  ;;  %v214_v13 = vld [vmem:[%s311_s1 + $0x8] sm:$0xff] }
   0x7   :  { %138 = vmatpush.bf16.msra.mxu1 %v223_v3  ;;  %v42_v11 = vpack.c.b16 %v40_v8, %v40_v8  ;;  %v213_v15 = vld [vmem:[%s311_s1] sm:$0xff]  ;;  %v41_v16 = vpack.c.b16 %v39_v14, %v39_v14 }
   0xa   :  { %122 = vmatpush.bf16.msra.mxu0 %v218_v4 }
   0xb   :  { %139 = vmatpush.bf16.msra.mxu1 %v222_v5 }
   0xe   :  { %123 = vmatpush.bf16.msra.mxu0 %v217_v7 }
   0xf   :  { %140 = vmatpush.bf16.msra.mxu1 %v221_v9 }
  0x12   :  { %124 = vmatpush.bf16.msra.mxu0 %v216_v10  ;;  %212 = vmatmul.msk.bf16.vlgmr.msra.gmra.mxu1 %vm116_vm0, %v42_v11 }
  0x16   :  { %125 = vmatpush.bf16.msra.mxu0 %v215_v12 }
  0x1a   :  { %126 = vmatpush.bf16.msra.mxu0 %v214_v13 }
  0x1e   :  { %127 = vmatpush.bf16.msra.mxu0 %v213_v15 }
  0x21   :  { %128 = vmatmul.bf16.vlgmr.msra.gmra.mxu0 %v41_v16 }
  0x8f   :  { %v142_v17 = vpop.f32.mrf.mxu1 }
  0x97   :  { %v144_v18 = vpop.f32.mrf.mxu1 }
  0x9e   :  { %v129_v19 = vpop.f32.mrf.mxu0 }
  0x9f   :  { %v143_v20 = vadd.f32 %v142_v17, %v129_v19 }
  0xa1   :  { %147 = vst.msk [vmem:[#allocation2] sm:$0xff] %vm146_vm1, %v143_v20 }
  0xa2   :  { %158 = dma.vmem_to_hbm [thread:$0]  %s154_s7, 128, %s156_s10, [#allocation3]  }
  0xa6   :  { %v131_v21 = vpop.f32.mrf.mxu0 }
  0xa7   :  { %250 = dma.done.wait [#allocation3], 128  }
  0xa8   :  { %251 = vsyncadd [#allocation3], 4294967168 }
  0xa9   :  { %163 = vsyncpa [#allocation3], 1 }

</bundles_post_ra>
